<compile_context>
chip_gen: v7x
topology: tpu7x:2x2x1
jax: 0.10.0
libtpu: 0.0.40
codegen_flags: <defaults>
</compile_context>

<pallas_src>
import functools

import jax
import jax.numpy as jnp
import numpy as np
from jax.experimental import pallas as pl
from jax.experimental.pallas import tpu as pltpu


def _lin_kernel(x_ref, p_ref, o_ref, *, eps):
    # x_ref: (NB, C, HW)   p_ref: (3, C, 1) with rows [rho, gamma, beta]
    x = x_ref[...].astype(jnp.float32)
    NB, C, HW = x.shape

    p = p_ref[...].astype(jnp.float32)        # (3, C, 1)
    rho = p[0:1]                              # (1, C, 1)
    gamma = p[1:2]                            # (1, C, 1)
    beta = p[2:3]                             # (1, C, 1)

    # ---- Per-(sample, channel) stats: one slab pass, two lane reductions ----
    ch_sum = jnp.sum(x, axis=-1, keepdims=True)              # (NB, C, 1)
    in_mean = ch_sum * (1.0 / HW)                            # (NB, C, 1)
    xc = x - in_mean                                         # (NB, C, HW)
    ch_ss = jnp.sum(xc * xc, axis=-1, keepdims=True)         # (NB, C, 1)

    # Instance-norm variance (unbiased, matching torch.var default).
    in_var = ch_ss * (1.0 / (HW - 1))
    in_rstd = jax.lax.rsqrt(in_var + eps)                    # (NB, C, 1)

    # Layer-norm stats derived from the per-channel stats (no second slab pass):
    #   sum_{c,hw}(x - ln_mean)^2 = sum_c ch_ss_c + HW * sum_c (in_mean_c - ln_mean)^2
    ln_mean = jnp.sum(ch_sum, axis=1, keepdims=True) * (1.0 / (C * HW))  # (NB,1,1)
    d = in_mean - ln_mean                                    # (NB, C, 1)
    ln_ss = (jnp.sum(ch_ss, axis=1, keepdims=True)
             + HW * jnp.sum(d * d, axis=1, keepdims=True))   # (NB, 1, 1)
    ln_var = ln_ss * (1.0 / (C * HW - 1))
    ln_rstd = jax.lax.rsqrt(ln_var + eps)                    # (NB, 1, 1)

    # ---- Fused, centered affine:  out = (x - in_mean) * A + B ----
    #   A = gamma * (rho * in_rstd + (1 - rho) * ln_rstd)
    #   B = beta  + gamma * (1 - rho) * ln_rstd * (in_mean - ln_mean)
    A = gamma * (rho * in_rstd + (1.0 - rho) * ln_rstd)      # (NB, C, 1)
    B = beta + gamma * (1.0 - rho) * (ln_rstd * d)           # (NB, C, 1)

    o_ref[...] = (xc * A + B).astype(o_ref.dtype)


def lin_forward(x, rho, gamma, beta, eps=1e-5):
    """LIN forward. x: (N, C, H, W); rho/gamma/beta: (1, C, 1, 1)."""
    N, C, H, W = x.shape
    HW = H * W
    if HW < 2:
        # torch.var with dim=[2,3] (unbiased) is undefined for a single element.
        raise ValueError("LIN requires H*W >= 2 for unbiased variance.")

    x2 = x.reshape(N, C, HW)  # spatial axis on the fast (lane) dim; free reshape
    params = jnp.concatenate(
        [rho.reshape(1, C, 1), gamma.reshape(1, C, 1), beta.reshape(1, C, 1)],
        axis=0,
    ).astype(jnp.float32)     # (3, C, 1): one tiny constant block

    slab_bytes = C * HW * 4   # per-sample f32 working slab

    # ---- Generation-aware VMEM budget (v5e/v6e: 128 MiB, v7x: 64 MiB) ----
    try:
        vmem_physical = int(pltpu.get_tpu_info().vmem_capacity_bytes)
    except Exception:
        vmem_physical = 64 * 1024 * 1024          # conservative (v7x) fallback
    vmem_budget = (vmem_physical * 3) // 4        # cap at ~75% of physical

    # ---- Pick samples-per-step NB (no divisibility constraint on N) ----
    target_block = 4 * 1024 * 1024                # ~4 MiB blocks: <10% step overhead
    NB = max(1, min(N, target_block // max(slab_bytes, 1)))
    if N >= 2:
        # Keep >= 2 grid steps so both TensorCores get work on v7x megacore.
        NB = min(NB, max(1, N // 2))
    # ~8x block working set (2x in + 2x out double buffers + f32 temps) must fit.
    NB = max(1, min(NB, max(1, (vmem_budget - (4 << 20)) // (8 * slab_bytes))))

    est_vmem = 8 * NB * slab_bytes
    vmem_limit = int(min(vmem_budget, max(est_vmem + (4 << 20), 32 << 20)))

    grid = (pl.cdiv(N, NB),)                      # partial last block is fine:
    # per-sample stats never mix samples and OOB writes are masked.

    out = pl.pallas_call(
        functools.partial(_lin_kernel, eps=eps),
        out_shape=jax.ShapeDtypeStruct((N, C, HW), x.dtype),
        grid=grid,
        in_specs=[
            pl.BlockSpec((NB, C, HW), lambda n: (n, 0, 0)),
            pl.BlockSpec((3, C, 1), lambda n: (0, 0, 0)),
        ],
        out_specs=pl.BlockSpec((NB, C, HW), lambda n: (n, 0, 0)),
        compiler_params=pltpu.CompilerParams(
            dimension_semantics=("parallel",),
            vmem_limit_bytes=vmem_limit,
        ),
    )(x2, params)
    return out.reshape(N, C, H, W)


def lin_reference(x, rho, gamma, beta, eps=1e-5):
    """Pure-JAX reference mirroring the PyTorch module (unbiased variance)."""
    N, C, H, W = x.shape
    HW = H * W
    in_mean = jnp.mean(x, axis=(2, 3), keepdims=True)
    in_var = jnp.sum((x - in_mean) ** 2, axis=(2, 3), keepdims=True) / (HW - 1)
    out_in = (x - in_mean) / jnp.sqrt(in_var + eps)
    ln_mean = jnp.mean(x, axis=(1, 2, 3), keepdims=True)
    ln_var = jnp.sum((x - ln_mean) ** 2, axis=(1, 2, 3), keepdims=True) / (
        C * HW - 1
    )
    out_ln = (x - ln_mean) / jnp.sqrt(ln_var + eps)
    out = rho * out_in + (1.0 - rho) * out_ln
    return out * gamma + beta


if __name__ == "__main__":
    N, C, H, W = 2, 4, 16, 16
    eps = 1e-5

    key = jax.random.PRNGKey(0)
    x = jax.random.normal(key, (N, C, H, W), dtype=jnp.float32)

    # Deterministic parameter init, matching the module's __init__:
    #   rho = 0, gamma = 1, beta = 0   (shapes (1, C, 1, 1))
    rho = jnp.zeros((1, C, 1, 1), dtype=jnp.float32)
    gamma = jnp.ones((1, C, 1, 1), dtype=jnp.float32)
    beta = jnp.zeros((1, C, 1, 1), dtype=jnp.float32)
    # Perturb rho a bit so the instance/layer mix path is actually exercised.
    rho = rho + 0.3

    out = lin_forward(x, rho, gamma, beta, eps=eps)
    out = jax.block_until_ready(out)

    ref = lin_reference(x, rho, gamma, beta, eps=eps)
    np.testing.assert_allclose(np.asarray(out), np.asarray(ref), rtol=1e-5, atol=1e-5)

    print("KERNEL_OK")
</pallas_src>

<mosaic_0001>
module attributes {stable_mosaic.version = 11 : i64} {
  func.func @_lin_kernel(%arg0: i32, %arg1: memref<1x4x256xf32, #tpu.memory_space<vmem>>, %arg2: memref<3x4x1xf32, #tpu.memory_space<vmem>>, %arg3: memref<1x4x256xf32, #tpu.memory_space<vmem>>) attributes {dimension_semantics = [#tpu.dimension_semantics<parallel>], iteration_bounds = array<i64: 2>, scalar_prefetch = 0 : i64, scratch_operands = 0 : i64, tpu.core_type = #tpu.core_type<tc>, window_params = [{transform_indices = @transform_0, window_bounds = array<i64: 1, 4, 256>}, {pipeline_mode = #tpu.pipeline_mode<synchronous>, transform_indices = @transform_1, window_bounds = array<i64: 3, 4, 1>}, {transform_indices = @transform_2, window_bounds = array<i64: 1, 4, 256>}]} {
    %c0 = arith.constant 0 : index
    %c0_0 = arith.constant 0 : index
    %c0_1 = arith.constant 0 : index
    %0 = vector.load %arg1[%c0, %c0_0, %c0_1] : memref<1x4x256xf32, #tpu.memory_space<vmem>>, vector<1x4x256xf32>
    %c0_2 = arith.constant 0 : index
    %c0_3 = arith.constant 0 : index
    %c0_4 = arith.constant 0 : index
    %1 = vector.load %arg2[%c0_2, %c0_3, %c0_4] : memref<3x4x1xf32, #tpu.memory_space<vmem>>, vector<3x4x1xf32>
    %2 = vector.extract_strided_slice %1 {offsets = [0, 0, 0], sizes = [1, 4, 1], strides = [1, 1, 1]} : vector<3x4x1xf32> to vector<1x4x1xf32>
    %3 = vector.extract_strided_slice %1 {offsets = [1, 0, 0], sizes = [1, 4, 1], strides = [1, 1, 1]} : vector<3x4x1xf32> to vector<1x4x1xf32>
    %4 = vector.extract_strided_slice %1 {offsets = [2, 0, 0], sizes = [1, 4, 1], strides = [1, 1, 1]} : vector<3x4x1xf32> to vector<1x4x1xf32>
    %cst = arith.constant dense<0.000000e+00> : vector<1x4xf32>
    %5 = vector.multi_reduction <add>, %0, %cst [2] : vector<1x4x256xf32> to vector<1x4xf32>
    %6 = vector.shape_cast %5 : vector<1x4xf32> to vector<1x4x1xf32>
    %cst_5 = arith.constant 3.906250e-03 : f32
    %7 = vector.broadcast %cst_5 : f32 to vector<1x4x1xf32>
    %8 = arith.mulf %6, %7 : vector<1x4x1xf32>
    %9 = vector.broadcast %8 : vector<1x4x1xf32> to vector<1x4x256xf32>
    %10 = arith.subf %0, %9 : vector<1x4x256xf32>
    %11 = arith.mulf %10, %10 : vector<1x4x256xf32>
    %cst_6 = arith.constant dense<0.000000e+00> : vector<1x4xf32>
    %12 = vector.multi_reduction <add>, %11, %cst_6 [2] : vector<1x4x256xf32> to vector<1x4xf32>
    %13 = vector.shape_cast %12 : vector<1x4xf32> to vector<1x4x1xf32>
    %cst_7 = arith.constant 0.00392156886 : f32
    %14 = vector.broadcast %cst_7 : f32 to vector<1x4x1xf32>
    %15 = arith.mulf %13, %14 : vector<1x4x1xf32>
    %cst_8 = arith.constant 9.99999974E-6 : f32
    %16 = vector.broadcast %cst_8 : f32 to vector<1x4x1xf32>
    %17 = arith.addf %15, %16 : vector<1x4x1xf32>
    %18 = math.rsqrt %17 : vector<1x4x1xf32>
    %cst_9 = arith.constant dense<0.000000e+00> : vector<1x1xf32>
    %19 = vector.multi_reduction <add>, %6, %cst_9 [1] : vector<1x4x1xf32> to vector<1x1xf32>
    %20 = vector.shape_cast %19 : vector<1x1xf32> to vector<1x1x1xf32>
    %cst_10 = arith.constant 9.765625E-4 : f32
    %21 = vector.broadcast %cst_10 : f32 to vector<1x1x1xf32>
    %22 = arith.mulf %20, %21 : vector<1x1x1xf32>
    %23 = vector.broadcast %22 : vector<1x1x1xf32> to vector<1x4x1xf32>
    %24 = arith.subf %8, %23 : vector<1x4x1xf32>
    %cst_11 = arith.constant dense<0.000000e+00> : vector<1x1xf32>
    %25 = vector.multi_reduction <add>, %13, %cst_11 [1] : vector<1x4x1xf32> to vector<1x1xf32>
    %26 = vector.shape_cast %25 : vector<1x1xf32> to vector<1x1x1xf32>
    %27 = arith.mulf %24, %24 : vector<1x4x1xf32>
    %cst_12 = arith.constant dense<0.000000e+00> : vector<1x1xf32>
    %28 = vector.multi_reduction <add>, %27, %cst_12 [1] : vector<1x4x1xf32> to vector<1x1xf32>
    %29 = vector.shape_cast %28 : vector<1x1xf32> to vector<1x1x1xf32>
    %cst_13 = arith.constant 2.560000e+02 : f32
    %30 = vector.broadcast %cst_13 : f32 to vector<1x1x1xf32>
    %31 = arith.mulf %30, %29 : vector<1x1x1xf32>
    %32 = arith.addf %26, %31 : vector<1x1x1xf32>
    %cst_14 = arith.constant 9.77517105E-4 : f32
    %33 = vector.broadcast %cst_14 : f32 to vector<1x1x1xf32>
    %34 = arith.mulf %32, %33 : vector<1x1x1xf32>
    %cst_15 = arith.constant 9.99999974E-6 : f32
    %35 = vector.broadcast %cst_15 : f32 to vector<1x1x1xf32>
    %36 = arith.addf %34, %35 : vector<1x1x1xf32>
    %37 = math.rsqrt %36 : vector<1x1x1xf32>
    %38 = arith.mulf %2, %18 : vector<1x4x1xf32>
    %cst_16 = arith.constant 1.000000e+00 : f32
    %39 = vector.broadcast %cst_16 : f32 to vector<1x4x1xf32>
    %40 = arith.subf %39, %2 : vector<1x4x1xf32>
    %41 = vector.broadcast %37 : vector<1x1x1xf32> to vector<1x4x1xf32>
    %42 = arith.mulf %40, %41 : vector<1x4x1xf32>
    %43 = arith.addf %38, %42 : vector<1x4x1xf32>
    %44 = arith.mulf %3, %43 : vector<1x4x1xf32>
    %cst_17 = arith.constant 1.000000e+00 : f32
    %45 = vector.broadcast %cst_17 : f32 to vector<1x4x1xf32>
    %46 = arith.subf %45, %2 : vector<1x4x1xf32>
    %47 = arith.mulf %3, %46 : vector<1x4x1xf32>
    %48 = vector.broadcast %37 : vector<1x1x1xf32> to vector<1x4x1xf32>
    %49 = arith.mulf %48, %24 : vector<1x4x1xf32>
    %50 = arith.mulf %47, %49 : vector<1x4x1xf32>
    %51 = arith.addf %4, %50 : vector<1x4x1xf32>
    %52 = vector.broadcast %44 : vector<1x4x1xf32> to vector<1x4x256xf32>
    %53 = arith.mulf %10, %52 : vector<1x4x256xf32>
    %54 = vector.broadcast %51 : vector<1x4x1xf32> to vector<1x4x256xf32>
    %55 = arith.addf %53, %54 : vector<1x4x256xf32>
    %c0_18 = arith.constant 0 : index
    %c0_19 = arith.constant 0 : index
    %c0_20 = arith.constant 0 : index
    %56 = vector.load %arg3[%c0_18, %c0_19, %c0_20] : memref<1x4x256xf32, #tpu.memory_space<vmem>>, vector<1x4x256xf32>
    tpu.vector_store %arg3[%c0_18, %c0_19, %c0_20], %55 {strides = array<i32>} : memref<1x4x256xf32, #tpu.memory_space<vmem>>, vector<1x4x256xf32>,
    return
  }
  func.func @transform_0(%arg0: i32) -> (i32, i32, i32) {
    %c0_i32 = arith.constant 0 : i32
    %c0_i32_0 = arith.constant 0 : i32
    %c0_i32_1 = arith.constant 0 : i32
    return %arg0, %c0_i32, %c0_i32_0 : i32, i32, i32
  }
  func.func @transform_1(%arg0: i32) -> (i32, i32, i32) {
    %c0_i32 = arith.constant 0 : i32
    %c0_i32_0 = arith.constant 0 : i32
    %c0_i32_1 = arith.constant 0 : i32
    %c0_i32_2 = arith.constant 0 : i32
    return %c0_i32, %c0_i32_0, %c0_i32_1 : i32, i32, i32
  }
  func.func @transform_2(%arg0: i32) -> (i32, i32, i32) {
    %c0_i32 = arith.constant 0 : i32
    %c0_i32_0 = arith.constant 0 : i32
    %c0_i32_1 = arith.constant 0 : i32
    return %arg0, %c0_i32, %c0_i32_0 : i32, i32, i32
  }
}

</mosaic_0001>

<bundles_post_ra>
// kernel: tpu_custom_call.1
= control target key start
LH: loop header
LB: loop body
LE: loop exit
PB: predicated region body
PF: predicated region fallthrough
CT: control target
= control target key end

     0   :  { %7 = vsyncpa [#allocation3], 0  ;;  %s725_s0 = inlined_call_operand.hbm [shape: f32[2,4,256], index: 0, kind: input, shape index: {}]   ;;  %s726_s1 = inlined_call_operand.vmem [shape: f32[3,4,1], index: 1, kind: input, shape index: {}]   ;;  %s727_s2 = inlined_call_operand.hbm [shape: f32[2,4,256], index: 2, kind: output, shape index: {}]  }
   0x1   :  { %9 = vsyncpa [#allocation3 + $0x1], 0 }
   0x2   :  { %10 = vsyncpa [#allocation4], 0 }
   0x3   :  { %12 = vsyncpa [#allocation4 + $0x1], 0  ;;  %s534_s9 = smov 0   ;;  %s536_s10 = smov 0  }
   0x4   :  { %s538_s11 = smov 0   ;;  %s540_s12 = smov 0  }
   0x5 LB: > { %s555_s13 = sadd.s32 4294967295, %s513_s12   ;;  %s346_s14 = sadd.s32 4294967294, %s513_s12   ;;  %s513_s12 = sphi %s540_s12, %s742_s12   ;;  %s509_s11 = sphi %s538_s11, %s741_s11   ;;  %s505_s10 = sphi %s536_s10, %s740_s10   ;;  %s501_s9 = sphi %s534_s9, %s739_s9  }
   0x6   : > { %s559_s15 = sadd.s32 1, %s513_s12   ;;  %s25_s16 = sadd.s32 1, %s509_s11 }
   0x7   : > { %s22_s17 = ssub.s32 %s513_s12, %s559_s15  ;;  %p32_p0 = scmp.ne.s32.totalorder %s509_s11, %s505_s10 }
   0x8   : > { %p23_p1 = scmp.eq.s32.totalorder %s22_s17, 0  ;;  %p33_p2 = scmp.eq.s32.totalorder %s513_s12, 0 }
   0x9   : > { %p38_p3 = scmp.ne.s32.totalorder %s505_s10, %s501_s9  ;;  %p39_p4 = scmp.eq.s32.totalorder %s555_s13, 0 }
   0xa   : > { %s571_s18 = scalar_select %p23_p1, %s509_s11, %s25_s16  }
   0xb   : > { %p573_p5 = por %p33_p2, %p32_p0  ;;  %p577_p6 = por %p39_p4, %p38_p3 }
   0xc   : > { %p83_p7 = scmp.eq.s32.totalorder %s555_s13, 1  ;;  %p89_p8 = scmp.eq.s32.totalorder %s346_s14, 1 }
   0xd   : > { %p374_p10 = scmp.lt.s32.totalorder %s513_s12, 2  ;;  %s112_s23 = sand.u32 1, %s509_s11  }
   0xe   : > { %p584_p11 = por %p83_p7, %p32_p0  ;;  %p588_p12 = por %p89_p8, %p38_p3 }
   0xf   : > { %s360_s24 = sshll.u32 %s513_s12, 7  ;;  %s349_s25 = sshll.u32 %s112_s23, 3 }
  0x10   : > { %s731_s21 = scalar_select %p584_p11, 1, 0 }
  0x11   : > { %s732_s22 = scalar_select %p588_p12, 1, 0 }
  0x12   : > { %s597_s28 = scalar_lea.hbm %s725_s0, %s360_s24  ;;  %s116_s29 = scalar_lea.vmem [#allocation2], %s349_s25 }
  0x13   : > { %s124_s30 = sshll.u32 %s116_s29, 4  ;;  %p601_p13 = pnand %p374_p10, %p573_p5  ;;  %s605_s30 = int_to_ptr.vmem [resolvable:$true] %s124_s30 }
  0x14   : > { %s113_s4 = scalar_lea.sflag [#allocation3], %s112_s23  ;;  %s417_s5 = scalar_lea.hbm %s597_s28, 128 }
  0x15   : > { %p418_p2 = scmp.ne.s32.totalorder %s597_s28, %s417_s5  ;;  %p419_p3 = pneg %p601_p13 }
  0x16   : > { %s422_s8 = scalar_lea.hbm %s725_s0, 256  ;;  %p423_p5 = scmp.lt.u32.totalorder %s597_s28, %s725_s0 }
  0x17   : > { %p420_p4 = pnand %p419_p3, %p418_p2  ;;  %p424_p8 = scmp.lt.u32.totalorder %s422_s8, %s417_s5 }
  0x18   : > { %p426_p9 = scmp.lt.u32.totalorder %s417_s5, %s597_s28 }
  0x19   : > { %p421_p7 = pneg %p420_p4  ;;  %p425_p10 = por %p424_p8, %p423_p5 }
  0x1b   : > { %p427_p0 = por %p426_p9, %p425_p10 }
  0x1d   : > { %p428_p1 = pnand %p427_p0, %p421_p7 }
  0x1f   : > { %431 = shalt.err (!%p428_p1)
}
  0x20   : > { %s432_s17 = scalar_lea.vmem %s605_s30, 128  ;;  %s515_s19 = smov [#allocation2]  }
  0x21   : > { %p433_p2 = scmp.ne.s32.totalorder %s605_s30, %s432_s17  ;;  %s437_s23 = sshll.u32 %s515_s19, 4  ;;  %s438_s23 = int_to_ptr.vmem [resolvable:$false] %s437_s23 }
  0x22   : > { %s439_s24 = scalar_lea.vmem %s438_s23, 256  ;;  %p440_p11 = scmp.lt.s32.totalorder %s605_s30, %s438_s23 }
  0x23   : > { %p435_p4 = pnand %p433_p2, %p419_p3  ;;  %p441_p5 = scmp.lt.s32.totalorder %s439_s24, %s432_s17 }
  0x25   : > { %p436_p12 = pneg %p435_p4  ;;  %p442_p8 = por %p441_p5, %p440_p11 }
  0x27   : > { %p443_p9 = pnand %p442_p8, %p436_p12 }
  0x29   : > { %446 = shalt.err (!%p443_p9)
}
  0x2a   : > { %369 = dma.hbm_to_vmem [thread:$0]  (!%p601_p13), %s597_s28, 128, %s605_s30, %s113_s4  }
  0x2b   : > { %p734_p0 = scmp.lt.s32.totalorder %s513_s12, 3  ;;  %p735_p1 = scmp.ge.s32.totalorder %s513_s12, 1 }
  0x2d   : > { %p130_p3 = pnand %p735_p1, %p734_p0 }
  0x2e   : > { %s639_s25 = sand.u32 (!%p130_p3), 1, %s505_s10  }
  0x2f   : > { %133 = sbr.rel (%p130_p3) target bundleno = 544 (0x220), region = 28  ;;  %s353_s26 = sshll.u32 (!%p130_p3), %s639_s25, 3 }
  0x30   : > { %s136_s27 = scalar_lea.sflag (!%p130_p3), [#allocation3], %s639_s25  ;;  %s139_s29 = scalar_lea.vmem (!%p130_p3), [#allocation2], %s353_s26 }
  0x36   : > { %492 = dma.done.wait (%p577_p6), %s136_s27, 128  }
  0x37   : > { %494 = vsyncadd (%p577_p6), %s136_s27, 4294967168  ;;  %vm167_vm0 = vcmask 1043456   ;;  %v160_v0 = vld [vmem:[%s139_s29] sm:$0xff]  ;;  %v516_v5 = vmov 839922192   ;;  %v178_v7 = vlaneseq  ;;  %v517_v20 = vmov 0  }
  0x38   : > { %v165_v1 = vcombine.high %v160_v0, %v160_v0  ;;  %v168_v2 = vsel %vm167_vm0, %v160_v0, 0.0  ;;  %v176_v6 = vunpack.c.l.s4 %v516_v5  ;;  %410 = vset.pattern.permute.xlu1 %v517_v20  ;;  %411 = vset.pattern.permute.xlu0 %v517_v20  ;;  %v161_v52 = vld [vmem:[%s726_s1] sm:$0xf]  ;;  %v162_v55 = vld [vmem:[%s726_s1 + $0x4] sm:$0xf]  ;;  %s361_s6 = sshll.u32 %s555_s13, 7 }
  0x39   : > { %v179_v9 = vshrl.u32 %v178_v7, 7  ;;  %v226_v53 = vsub.f32 1.0, %v161_v52  ;;  %s159_s7 = scalar_lea.vmem [#allocation5], %s353_s26  ;;  %s681_s17 = scalar_lea.hbm %s727_s2, %s361_s6 }
  0x3a   : > { %v169_v3 = vsel %vm167_vm0, %v165_v1, 0.0  ;;  %v177_v8 = vunpack.c.0.s8 %v176_v6  ;;  %s276_s8 = sshll.u32 %s159_s7, 4  ;;  %s262_s13 = scalar_lea.sflag [#allocation4], %s639_s25  ;;  %s683_s8 = int_to_ptr.vmem [resolvable:$true] %s276_s8 }
  0x3b   : > { %v170_v4 = vadd.f32 %v169_v3, %v168_v2  ;;  %v230_v59 = vmul.f32 %v226_v53, %v162_v55  ;;  %s447_s19 = scalar_lea.vmem %s683_s8, 128  ;;  %p736_p11 = scmp.ne.s32.totalorder %s731_s21, 0 }
  0x3c   : > { %v651_v10 = vsub.s32 %v177_v8, %v179_v9  ;;  %p448_p6 = scmp.ne.s32.totalorder %s683_s8, %s447_s19  ;;  %s518_s23 = smov [#allocation5]  }
  0x3d   : > { %171 = vadd.xlane.f32.xlu0 %v170_v4  ;;  %s451_s24 = sshll.u32 %s518_s23, 4  ;;  %s452_s24 = int_to_ptr.vmem [resolvable:$false] %s451_s24 }
  0x3e   : > { %p449_p12 = pnand %p448_p6, %p736_p11  ;;  %s453_s26 = scalar_lea.vmem %s452_s24, 256 }
  0x3f   : > { %p454_p7 = scmp.lt.s32.totalorder %s683_s8, %s452_s24  ;;  %p455_p10 = scmp.lt.s32.totalorder %s453_s26, %s447_s19 }
  0x40   : > { %p450_p13 = pneg %p449_p12 }
  0x41   : > { %p456_p2 = por %p455_p10, %p454_p7 }
  0x43   : > { %p457_p4 = pnand %p456_p2, %p450_p13 }
  0xca   : > { %v172_v11 = vpop.xlane.xlu0 %171 }
  0xcb   : > { %v173_v12 = vmul.f32 0.00390625, %v172_v11  ;;  %v196_v21 = vsel %vm167_vm0, %v172_v11, 0.0 }
  0xcc   : > { %v197_v22 = vrot.slane %v196_v21, 4 }
  0xcd   : > { %v181_v13 = vrot.slane %v173_v12, %v651_v10 }
  0xce   : > { %v198_v23 = vadd.f32 %v197_v22, %v196_v21 }
  0xcf   : > { %v654_v14 = vsub.f32 %v160_v0, %v181_v13  ;;  %v163_v0 = vld [vmem:[%s726_s1 + $0x8] sm:$0xf] }
  0xd0   : > { %v199_v24 = vrot.slane %v198_v23, 2 }
  0xd1   : > { %v184_v15 = vmul.f32 %v654_v14, %v654_v14 }
  0xd2   : > { %v200_v25 = vadd.f32 %v199_v24, %v198_v23 }
  0xd3   : > { %v186_v16 = vcombine.high %v184_v15, %v184_v15  ;;  %v188_v17 = vsel %vm167_vm0, %v184_v15, 0.0 }
  0xd4   : > { %v201_v26 = vrot.slane %v200_v25, 1 }
  0xd5   : > { %v189_v18 = vsel %vm167_vm0, %v186_v16, 0.0 }
  0xd6   : > { %v190_v19 = vadd.f32 %v189_v18, %v188_v17  ;;  %v202_v27 = vadd.f32 %v201_v26, %v200_v25 }
  0xd8   : > { %191 = vadd.xlane.f32.xlu0 %v190_v19  ;;  %v203_v28 = vmul.f32 0.0009765625, %v202_v27 }
  0xda   : > { %v204_v29 = vsub.f32 %v173_v12, %v203_v28 }
  0xdc   : > { %v212_v30 = vmul.f32 %v204_v29, %v204_v29 }
  0xde   : > { %v213_v31 = vsel %vm167_vm0, %v212_v30, 0.0 }
  0xdf   : > { %v214_v32 = vrot.slane %v213_v31, 4 }
  0xe1   : > { %v215_v33 = vadd.f32 %v214_v32, %v213_v31 }
  0xe3   : > { %v216_v34 = vrot.slane %v215_v33, 2 }
  0xe5   : > { %v217_v35 = vadd.f32 %v216_v34, %v215_v33 }
  0xe7   : > { %v218_v40 = vrot.slane %v217_v35, 1 }
  0xe9   : > { %v219_v43 = vadd.f32 %v218_v40, %v217_v35 }
  0xeb   : > { %v220_v47 = vmul.f32 256.0, %v219_v43 }
 0x165   : > { %v192_v36 = vpop.xlane.xlu0 %191 }
 0x166   : > { %v205_v37 = vsel %vm167_vm0, %v192_v36, 0.0  ;;  %v193_v44 = vmul.f32 0.003921569, %v192_v36 }
 0x167   : > { %v206_v38 = vrot.slane %v205_v37, 4 }
 0x168   : > { %v194_v48 = vadd.f32 1e-05, %v193_v44 }
 0x169   : > { %v207_v39 = vadd.f32 %v206_v38, %v205_v37 }
 0x16a   : > { %413 = vrsqrt.f32 %v194_v48 }
 0x16b   : > { %v208_v41 = vrot.slane %v207_v39, 2 }
 0x16d   : > { %v209_v42 = vadd.f32 %v208_v41, %v207_v39 }
 0x16f   : > { %v210_v45 = vrot.slane %v209_v42, 1 }
 0x171   : > { %v211_v46 = vadd.f32 %v210_v45, %v209_v42 }
 0x173   : > { %v221_v49 = vadd.f32 %v220_v47, %v211_v46 }
 0x174   : > { %v414_v54 = vpop.eup %413 }
 0x175   : > { %v222_v50 = vmul.f32 0.0009775171, %v221_v49  ;;  %v225_v57 = vmul.f32 %v414_v54, %v161_v52 }
 0x177   : > { %v223_v51 = vadd.f32 1e-05, %v222_v50 }
 0x179   : > { %415 = vrsqrt.f32 %v223_v51 }
 0x183   : > { %v416_v56 = vpop.eup %415 }
 0x184   : > { %v227_v58 = vmul.f32 %v416_v56, %v226_v53  ;;  %v231_v60 = vmul.f32 %v416_v56, %v204_v29 }
 0x186   : > { %v228_v61 = vadd.f32 %v227_v58, %v225_v57  ;;  %v232_v63 = vmul.f32 %v231_v60, %v230_v59 }
 0x188   : > { %v229_v62 = vmul.f32 %v228_v61, %v162_v55  ;;  %v233_v1 = vadd.f32 %v232_v63, %v163_v0 }
 0x18a   : > { %236 = vperm.xlu1 %410, %v229_v62  }
 0x18e   : > { %249 = vperm.xlu1 %410, %v233_v1  }
 0x209   : > { %v237_v2 = vpop.permute.xlu1 %236 }
 0x20a   : > { %v244_v3 = vrot.slane %v237_v2, %v651_v10 }
 0x20c   : > { %v246_v5 = vmul.f32 %v244_v3, %v654_v14 }
 0x20d   : > { %v250_v4 = vpop.permute.xlu1 %249 }
 0x20e   : > { %v257_v6 = vrot.slane %v250_v4, %v651_v10 }
 0x210   : > { %v259_v7 = vadd.f32 %v257_v6, %v246_v5 }
 0x212   : > { %260 = vst [vmem:[%s159_s7] sm:$0xff] %v259_v7 }
 0x213   : > { %460 = shalt.err (!%p457_p4)
}
 0x214   : > { %s461_s25 = scalar_lea.hbm %s681_s17, 128  ;;  %s465_s20 = scalar_lea.hbm %s727_s2, 256 }
 0x215   : > { %p462_p5 = scmp.ne.s32.totalorder %s681_s17, %s461_s25  ;;  %p466_p0 = scmp.lt.u32.totalorder %s681_s17, %s727_s2 }
 0x216   : > { %p467_p1 = scmp.lt.u32.totalorder %s465_s20, %s461_s25  ;;  %p469_p6 = scmp.lt.u32.totalorder %s461_s25, %s681_s17 }
 0x217   : > { %p463_p8 = pnand %p462_p5, %p736_p11 }
 0x218   : > { %p468_p3 = por %p467_p1, %p466_p0 }
 0x219   : > { %p464_p9 = pneg %p463_p8 }
 0x21a   : > { %p470_p12 = por %p469_p6, %p468_p3 }
 0x21c   : > { %p471_p13 = pnand %p470_p12, %p464_p9 }
 0x21e   : > { %474 = shalt.err (!%p471_p13)
}
 0x21f   : > { %364 = dma.vmem_to_hbm [thread:$0]  (%p736_p11), %s683_s8, 128, %s681_s17, %s262_s13  }
 0x220 PF: > { %s288_s3 = sand.u32 1, %s501_s9   ;;  %p737_p7 = scmp.ne.s32.totalorder %s732_s22, 0 }
 0x221   : > { %p738_p10 = scmp.ge.s32.totalorder %s513_s12, 2  ;;  %s289_s4 = scalar_lea.sflag [#allocation4], %s288_s3 }
 0x223   : > { %p371_p2 = pnand %p738_p10, %p737_p7 }
 0x225   : > { %496 = dma.done.wait (!%p371_p2), %s289_s4, 128  }
 0x226   : > { %498 = vsyncadd (!%p371_p2), %s289_s4, 4294967168  ;;  %p15_p4 = scmp.ge.s32.totalorder %s559_s15, 4   ;;  %s739_s9 = smov %s505_s10 }
 0x227   : > { %s740_s10 = smov %s509_s11  ;;  %s741_s11 = smov %s571_s18 }
 0x228   : > { %s742_s12 = smov %s559_s15  ;;  %17 = sbr.rel (!%p15_p4) target bundleno = 5 (0x5), region = 73 }
 0x22f   :  { %294 = vsyncpa [#allocation3], 1 }
 0x230   :  { %296 = vsyncpa [#allocation3 + $0x1], 1 }
 0x231   :  { %297 = vsyncpa [#allocation4], 1 }
 0x232   :  { %299 = vsyncpa [#allocation4 + $0x1], 1 }

</bundles_post_ra>
